<compile_context>
chip_gen: v7x
topology: tpu7x:2x2x1
jax: 0.10.0
libtpu: 0.0.40
codegen_flags: <defaults>
</compile_context>

<pallas_src>
import functools

import jax
import jax.numpy as jnp
from jax import lax
from jax.experimental import pallas as pl
from jax.experimental.pallas import tpu as pltpu


def _round_up(a: int, b: int) -> int:
    return (a + b - 1) // b * b


def _csgu_kernel(xr_ref, xg_ref, lh_ref, rh_ref, w_ref, b_ref, pv_ref,
                 o_ref, xn_ref, *, K, pad, Hb, Tt, T, C, eps):
    """One grid step = one (batch, time-tile) pair.

    xr_ref: (1, Tt, C)   residual (gating) half of the features
    xg_ref: (1, Tt, C)   half that is normalized + convolved
    lh_ref: (1, Hb, C)   raw x_g rows of the Hb-block just before this tile
    rh_ref: (1, Hb, C)   raw x_g rows of the Hb-block just after this tile
    w_ref:  (K, C)       depthwise conv weight with gamma folded in
    b_ref:  (1, C)       conv bias with beta folded in
    pv_ref: (1, C)       scratch fill value for out-of-sequence rows (-beta/gamma)
    o_ref:  (1, Tt, C)   output tile
    xn_ref: (Hb + Tt + Hb, C) scratch (input dtype) holding the normalized conv window
    """
    j = pl.program_id(1)
    t0 = j * Tt
    inv_c = jnp.float32(1.0 / C)
    pad_val = pv_ref[...]                                   # (1, C)

    def layernorm(v):                                       # affine folded into conv
        v32 = v.astype(jnp.float32)
        mean = jnp.sum(v32, axis=-1, keepdims=True) * inv_c
        var = jnp.sum(v32 * v32, axis=-1, keepdims=True) * inv_c - mean * mean
        var = jnp.maximum(var, 0.0)
        return ((v32 - mean) * lax.rsqrt(var + eps)).astype(xn_ref.dtype)

    # ---- center rows: LayerNorm of x_g for this time tile ----
    xn_c = layernorm(xg_ref[0])                             # (Tt, C)
    if T % Tt != 0:                                         # static: only if T is ragged
        row = lax.broadcasted_iota(jnp.int32, (Tt, 1), 0)
        xn_c = jnp.where(t0 + row < T, xn_c, pad_val)       # rows >= T act as conv padding
    xn_ref[Hb:Hb + Tt, :] = xn_c

    # ---- halo rows (conv receptive field crosses the tile boundary) ----
    if pad > 0:                                             # static
        @pl.when(j == 0)
        def _():                                            # rows < 0: conv padding
            xn_ref[0:Hb, :] = jnp.broadcast_to(pad_val, (Hb, C))

        @pl.when(j > 0)
        def _():                                            # previous tile's tail rows
            xn_ref[0:Hb, :] = layernorm(lh_ref[0])

        rh = layernorm(rh_ref[0])                           # next tile's head rows
        row = lax.broadcasted_iota(jnp.int32, (Hb, 1), 0)
        xn_ref[Hb + Tt:Hb + Tt + Hb, :] = jnp.where(t0 + Tt + row < T, rh, pad_val)

    # ---- depthwise Conv1d along time: K static taps read from the scratch ----
    y = b_ref[...]                                          # (1, C), broadcasts on first add
    base = Hb - pad
    for k in range(K):                                      # static unroll
        y = y + xn_ref[base + k:base + k + Tt, :] * w_ref[k:k + 1, :]

    # ---- identity activation, gating, dropout == identity (inference) ----
    x_r = xr_ref[0]
    o_ref[0] = (x_r * y.astype(x_r.dtype)).astype(o_ref.dtype)


def csgu_forward(x, gamma, beta, conv_w, conv_b, *, eps=1e-5, time_tile=512):
    """x: (N, T, D); gamma/beta/conv_b: (C,); conv_w: (K, C) with w[k,c]=torch_w[c,0,k].

    Returns (N, T, D//2).
    """
    N, T, D = x.shape
    C = D // 2
    K = conv_w.shape[0]
    assert K % 2 == 1, "only odd kernel_size matches torch 'same' padding=(K-1)//2"
    pad = (K - 1) // 2

    # Halo block = one sublane-aligned group of rows from the neighbouring time tiles.
    Hb = _round_up(max(pad, 1), 16)
    # Time tile: multiple of Hb (so halo blocks line up with tile edges), >= Hb.
    Tt = max(min(int(time_tile), _round_up(T, 16)), Hb)
    Tt = _round_up(Tt, Hb)
    n_t = -(-T // Tt)
    mb = Tt // Hb                    # halo blocks per time tile
    nhb = -(-T // Hb)                # number of halo blocks along T

    cdtype = x.dtype

    # ---- fold the LayerNorm affine into the depthwise conv parameters (in f32) ----
    g32 = gamma.astype(jnp.float32)
    b32 = beta.astype(jnp.float32)
    w32 = conv_w.astype(jnp.float32)
    w_fold = (w32 * g32[None, :]).astype(cdtype)                             # (K, C)
    b_fold = (conv_b.astype(jnp.float32) + b32 * jnp.sum(w32, axis=0))
    b_fold = b_fold.astype(cdtype).reshape(1, C)
    # torch zero-pads the affine LN output; with gamma folded into the weights the
    # equivalent fill value for the un-affined scratch is -beta/gamma.
    safe_g = jnp.where(g32 == 0, 1.0, g32)
    pad_val = jnp.where(g32 == 0, 0.0, -b32 / safe_g).astype(cdtype).reshape(1, C)

    lane_aligned = (C % 128 == 0)
    if lane_aligned:
        # Production path: residual half, gated half and both halos are BlockSpec views
        # of the SAME array -> zero wrapper-side HBM passes.
        srcs = (x, x, x, x)
        r_last, g_last = 0, 1            # block index on the last (feature) dim
    else:
        # Small-C fallback (toy shapes only): last-dim block must equal the full dim,
        # so split the halves once in the wrapper.
        x_r_arr = x[:, :, :C]
        x_g_arr = x[:, :, C:]
        srcs = (x_r_arr, x_g_arr, x_g_arr, x_g_arr)
        r_last, g_last = 0, 0

    r_spec = pl.BlockSpec((1, Tt, C), lambda n, j: (n, j, r_last))
    g_spec = pl.BlockSpec((1, Tt, C), lambda n, j: (n, j, g_last))
    lh_spec = pl.BlockSpec(
        (1, Hb, C), lambda n, j: (n, jnp.maximum(j * mb - 1, 0), g_last))
    rh_spec = pl.BlockSpec(
        (1, Hb, C), lambda n, j: (n, jnp.minimum((j + 1) * mb, nhb - 1), g_last))

    # VMEM budget: double-buffered blocks + params + scratch, with headroom;
    # clamp to v7x's 64 MiB per-TC VMEM.
    itemsize = x.dtype.itemsize
    block_bytes = (3 * Tt * C + 2 * Hb * C) * itemsize       # xr + xg + out + 2 halos
    param_bytes = (K * C + 2 * C) * itemsize
    scratch_bytes = (Tt + 2 * Hb) * C * itemsize
    est = 2 * (block_bytes + param_bytes) + scratch_bytes
    vmem_limit = int(min(max(2 * est + (8 << 20), 32 << 20), 64 << 20))

    kernel = functools.partial(_csgu_kernel, K=K, pad=pad, Hb=Hb, Tt=Tt, T=T, C=C,
                               eps=float(eps))

    return pl.pallas_call(
        kernel,
        out_shape=jax.ShapeDtypeStruct((N, T, C), x.dtype),
        grid=(N, n_t),
        in_specs=[
            r_spec,
            g_spec,
            lh_spec,
            rh_spec,
            pl.BlockSpec((K, C), lambda n, j: (0, 0)),
            pl.BlockSpec((1, C), lambda n, j: (0, 0)),
            pl.BlockSpec((1, C), lambda n, j: (0, 0)),
        ],
        out_specs=pl.BlockSpec((1, Tt, C), lambda n, j: (n, j, 0)),
        scratch_shapes=[pltpu.VMEM((Tt + 2 * Hb, C), cdtype)],
        compiler_params=pltpu.CompilerParams(
            dimension_semantics=("parallel", "parallel"),
            vmem_limit_bytes=vmem_limit,
        ),
    )(*srcs, w_fold, b_fold, pad_val)


def csgu_reference(x, gamma, beta, conv_w, conv_b, *, eps=1e-5):
    """Plain-JAX reference mirroring the PyTorch forward (no folding)."""
    N, T, D = x.shape
    C = D // 2
    K = conv_w.shape[0]
    pad = (K - 1) // 2

    x_r, x_g = jnp.split(x, 2, axis=-1)
    mean = x_g.mean(-1, keepdims=True)
    var = ((x_g - mean) ** 2).mean(-1, keepdims=True)
    xn = (x_g - mean) / jnp.sqrt(var + eps) * gamma + beta

    rhs = conv_w.reshape(K, 1, C)     # WIO, feature_group_count = C (depthwise)
    y = lax.conv_general_dilated(
        xn, rhs, window_strides=(1,), padding=[(pad, pad)],
        dimension_numbers=("NWC", "WIO", "NWC"), feature_group_count=C,
    ) + conv_b
    return x_r * y


if __name__ == "__main__":
    # Two small configs consistent with the module (intermediate_size D, n_channels C=D/2,
    # odd csgu_kernel_size, identity activation, no linear-after-conv, non-causal, eval):
    #   1) C=16  -> small-C fallback path, 3 time tiles, ragged T, halos across tiles.
    #   2) C=128 -> lane-aligned production path (dual-BlockSpec halves, zero copies).
    def run_case(N, T, D, K, time_tile, key):
        C = D // 2
        k1, k2, k3, k4, k5 = jax.random.split(key, 5)
        x = jax.random.normal(k1, (N, T, D), dtype=jnp.float32)
        gamma = 1.0 + 0.1 * jax.random.normal(k2, (C,), dtype=jnp.float32)
        beta = 0.1 * jax.random.normal(k3, (C,), dtype=jnp.float32)
        conv_w = 0.1 * jax.random.normal(k4, (K, C), dtype=jnp.float32)
        conv_b = 0.1 * jax.random.normal(k5, (C,), dtype=jnp.float32)

        out = csgu_forward(x, gamma, beta, conv_w, conv_b, time_tile=time_tile)
        out = jax.block_until_ready(out)
        ref = csgu_reference(x, gamma, beta, conv_w, conv_b)
        assert out.shape == (N, T, C), out.shape
        err = float(jnp.max(jnp.abs(out - ref)))
        assert err < 1e-4, (N, T, D, K, err)

    key = jax.random.PRNGKey(0)
    k1, k2 = jax.random.split(key)
    run_case(N=2, T=40, D=32, K=7, time_tile=16, key=k1)    # fallback path
    run_case(N=2, T=20, D=256, K=5, time_tile=16, key=k2)   # lane-aligned path

    # TODO(synk): dropout is treated as identity (inference); training-mode dropout would need pltpu PRNG.
    print("KERNEL_OK")
</pallas_src>

<mosaic_0001>
module attributes {stable_mosaic.version = 11 : i64} {
  func.func @_csgu_kernel(%arg0: i32, %arg1: i32, %arg2: memref<1x16x16xf32, #tpu.memory_space<vmem>>, %arg3: memref<1x16x16xf32, #tpu.memory_space<vmem>>, %arg4: memref<1x16x16xf32, #tpu.memory_space<vmem>>, %arg5: memref<1x16x16xf32, #tpu.memory_space<vmem>>, %arg6: memref<7x16xf32, #tpu.memory_space<vmem>>, %arg7: memref<1x16xf32, #tpu.memory_space<vmem>>, %arg8: memref<1x16xf32, #tpu.memory_space<vmem>>, %arg9: memref<1x16x16xf32, #tpu.memory_space<vmem>>, %arg10: memref<48x16xf32, #tpu.memory_space<vmem>>) attributes {dimension_semantics = [#tpu.dimension_semantics<parallel>, #tpu.dimension_semantics<parallel>], iteration_bounds = array<i64: 2, 3>, scalar_prefetch = 0 : i64, scratch_operands = 1 : i64, tpu.core_type = #tpu.core_type<tc>, window_params = [{transform_indices = @transform_0, window_bounds = array<i64: 1, 16, 16>}, {transform_indices = @transform_1, window_bounds = array<i64: 1, 16, 16>}, {transform_indices = @transform_2, window_bounds = array<i64: 1, 16, 16>}, {transform_indices = @transform_3, window_bounds = array<i64: 1, 16, 16>}, {pipeline_mode = #tpu.pipeline_mode<synchronous>, transform_indices = @transform_4, window_bounds = array<i64: 7, 16>}, {pipeline_mode = #tpu.pipeline_mode<synchronous>, transform_indices = @transform_5, window_bounds = array<i64: 1, 16>}, {pipeline_mode = #tpu.pipeline_mode<synchronous>, transform_indices = @transform_6, window_bounds = array<i64: 1, 16>}, {transform_indices = @transform_7, window_bounds = array<i64: 1, 16, 16>}]} {
    %c16_i32 = arith.constant 16 : i32
    %0 = arith.muli %arg1, %c16_i32 : i32
    %c0 = arith.constant 0 : index
    %c0_0 = arith.constant 0 : index
    %1 = vector.load %arg8[%c0, %c0_0] : memref<1x16xf32, #tpu.memory_space<vmem>>, vector<1x16xf32>
    %c0_1 = arith.constant 0 : index
    %c0_2 = arith.constant 0 : index
    %c0_3 = arith.constant 0 : index
    %2 = vector.load %arg3[%c0_1, %c0_2, %c0_3] : memref<1x16x16xf32, #tpu.memory_space<vmem>>, vector<1x16x16xf32>
    %3 = vector.shape_cast %2 : vector<1x16x16xf32> to vector<16x16xf32>
    %cst = arith.constant dense<0.000000e+00> : vector<16xf32>
    %4 = vector.multi_reduction <add>, %3, %cst [1] : vector<16x16xf32> to vector<16xf32>
    %5 = vector.shape_cast %4 : vector<16xf32> to vector<16x1xf32>
    %cst_4 = arith.constant 6.250000e-02 : f32
    %6 = vector.broadcast %cst_4 : f32 to vector<16x1xf32>
    %7 = arith.mulf %5, %6 : vector<16x1xf32>
    %8 = arith.mulf %3, %3 : vector<16x16xf32>
    %cst_5 = arith.constant dense<0.000000e+00> : vector<16xf32>
    %9 = vector.multi_reduction <add>, %8, %cst_5 [1] : vector<16x16xf32> to vector<16xf32>
    %10 = vector.shape_cast %9 : vector<16xf32> to vector<16x1xf32>
    %cst_6 = arith.constant 6.250000e-02 : f32
    %11 = vector.broadcast %cst_6 : f32 to vector<16x1xf32>
    %12 = arith.mulf %10, %11 : vector<16x1xf32>
    %13 = arith.mulf %7, %7 : vector<16x1xf32>
    %14 = arith.subf %12, %13 : vector<16x1xf32>
    %cst_7 = arith.constant 0.000000e+00 : f32
    %15 = vector.broadcast %cst_7 : f32 to vector<16x1xf32>
    %16 = arith.maximumf %14, %15 : vector<16x1xf32>
    %17 = vector.broadcast %7 : vector<16x1xf32> to vector<16x16xf32>
    %18 = arith.subf %3, %17 : vector<16x16xf32>
    %cst_8 = arith.constant 9.99999974E-6 : f32
    %19 = vector.broadcast %cst_8 : f32 to vector<16x1xf32>
    %20 = arith.addf %16, %19 : vector<16x1xf32>
    %21 = math.rsqrt %20 : vector<16x1xf32>
    %22 = vector.broadcast %21 : vector<16x1xf32> to vector<16x16xf32>
    %23 = arith.mulf %18, %22 : vector<16x16xf32>
    %24 = tpu.iota {dimensions = array<i32: 0>} : vector<16x1xi32>
    %25 = vector.broadcast %0 : i32 to vector<16x1xi32>
    %26 = arith.addi %25, %24 : vector<16x1xi32>
    %c40_i32 = arith.constant 40 : i32
    %27 = vector.broadcast %c40_i32 : i32 to vector<16x1xi32>
    %28 = arith.cmpi slt, %26, %27 : vector<16x1xi32>
    %29 = vector.shape_cast %28 : vector<16x1xi1> to vector<16x1xi1>
    %30 = vector.broadcast %29 : vector<16x1xi1> to vector<16x16xi1>
    %31 = vector.shape_cast %1 : vector<1x16xf32> to vector<1x16xf32>
    %32 = vector.broadcast %31 : vector<1x16xf32> to vector<16x16xf32>
    %33 = arith.select %30, %23, %32 : vector<16x16xi1>, vector<16x16xf32>
    %c16 = arith.constant 16 : index
    %c0_9 = arith.constant 0 : index
    %34 = vector.load %arg10[%c16, %c0_9] : memref<48x16xf32, #tpu.memory_space<vmem>>, vector<16x16xf32>
    tpu.vector_store %arg10[%c16, %c0_9], %33 {strides = array<i32>} : memref<48x16xf32, #tpu.memory_space<vmem>>, vector<16x16xf32>,
    %c0_i32 = arith.constant 0 : i32
    %35 = arith.cmpi eq, %arg1, %c0_i32 : i32
    %36 = arith.extui %35 : i1 to i32
    %c0_i32_10 = arith.constant 0 : i32
    %37 = arith.cmpi ne, %36, %c0_i32_10 : i32
    scf.if %37 {
      %118 = vector.shape_cast %1 : vector<1x16xf32> to vector<1x16xf32>
      %119 = vector.broadcast %118 : vector<1x16xf32> to vector<16x16xf32>
      %c0_50 = arith.constant 0 : index
      %c0_51 = arith.constant 0 : index
      %120 = vector.load %arg10[%c0_50, %c0_51] : memref<48x16xf32, #tpu.memory_space<vmem>>, vector<16x16xf32>
      tpu.vector_store %arg10[%c0_50, %c0_51], %119 {strides = array<i32>} : memref<48x16xf32, #tpu.memory_space<vmem>>, vector<16x16xf32>,
    } else {
    }
    %c0_i32_11 = arith.constant 0 : i32
    %38 = arith.cmpi sgt, %arg1, %c0_i32_11 : i32
    %39 = arith.extui %38 : i1 to i32
    %cst_12 = arith.constant 6.250000e-02 : f32
    %c0_i32_13 = arith.constant 0 : i32
    %40 = arith.cmpi ne, %39, %c0_i32_13 : i32
    scf.if %40 {
      %c0_50 = arith.constant 0 : index
      %c0_51 = arith.constant 0 : index
      %c0_52 = arith.constant 0 : index
      %118 = vector.load %arg4[%c0_50, %c0_51, %c0_52] : memref<1x16x16xf32, #tpu.memory_space<vmem>>, vector<1x16x16xf32>
      %119 = vector.shape_cast %118 : vector<1x16x16xf32> to vector<16x16xf32>
      %cst_53 = arith.constant dense<0.000000e+00> : vector<16xf32>
      %120 = vector.multi_reduction <add>, %119, %cst_53 [1] : vector<16x16xf32> to vector<16xf32>
      %121 = vector.shape_cast %120 : vector<16xf32> to vector<16x1xf32>
      %122 = vector.broadcast %cst_12 : f32 to vector<16x1xf32>
      %123 = arith.mulf %121, %122 : vector<16x1xf32>
      %124 = arith.mulf %119, %119 : vector<16x16xf32>
      %cst_54 = arith.constant dense<0.000000e+00> : vector<16xf32>
      %125 = vector.multi_reduction <add>, %124, %cst_54 [1] : vector<16x16xf32> to vector<16xf32>
      %126 = vector.shape_cast %125 : vector<16xf32> to vector<16x1xf32>
      %127 = vector.broadcast %cst_12 : f32 to vector<16x1xf32>
      %128 = arith.mulf %126, %127 : vector<16x1xf32>
      %129 = arith.mulf %123, %123 : vector<16x1xf32>
      %130 = arith.subf %128, %129 : vector<16x1xf32>
      %cst_55 = arith.constant 0.000000e+00 : f32
      %131 = vector.broadcast %cst_55 : f32 to vector<16x1xf32>
      %132 = arith.maximumf %130, %131 : vector<16x1xf32>
      %133 = vector.broadcast %123 : vector<16x1xf32> to vector<16x16xf32>
      %134 = arith.subf %119, %133 : vector<16x16xf32>
      %cst_56 = arith.constant 9.99999974E-6 : f32
      %135 = vector.broadcast %cst_56 : f32 to vector<16x1xf32>
      %136 = arith.addf %132, %135 : vector<16x1xf32>
      %137 = math.rsqrt %136 : vector<16x1xf32>
      %138 = vector.broadcast %137 : vector<16x1xf32> to vector<16x16xf32>
      %139 = arith.mulf %134, %138 : vector<16x16xf32>
      %c0_57 = arith.constant 0 : index
      %c0_58 = arith.constant 0 : index
      %140 = vector.load %arg10[%c0_57, %c0_58] : memref<48x16xf32, #tpu.memory_space<vmem>>, vector<16x16xf32>
      tpu.vector_store %arg10[%c0_57, %c0_58], %139 {strides = array<i32>} : memref<48x16xf32, #tpu.memory_space<vmem>>, vector<16x16xf32>,
    } else {
    }
    %c0_14 = arith.constant 0 : index
    %c0_15 = arith.constant 0 : index
    %c0_16 = arith.constant 0 : index
    %41 = vector.load %arg5[%c0_14, %c0_15, %c0_16] : memref<1x16x16xf32, #tpu.memory_space<vmem>>, vector<1x16x16xf32>
    %42 = vector.shape_cast %41 : vector<1x16x16xf32> to vector<16x16xf32>
    %cst_17 = arith.constant dense<0.000000e+00> : vector<16xf32>
    %43 = vector.multi_reduction <add>, %42, %cst_17 [1] : vector<16x16xf32> to vector<16xf32>
    %44 = vector.shape_cast %43 : vector<16xf32> to vector<16x1xf32>
    %cst_18 = arith.constant 6.250000e-02 : f32
    %45 = vector.broadcast %cst_18 : f32 to vector<16x1xf32>
    %46 = arith.mulf %44, %45 : vector<16x1xf32>
    %47 = arith.mulf %42, %42 : vector<16x16xf32>
    %cst_19 = arith.constant dense<0.000000e+00> : vector<16xf32>
    %48 = vector.multi_reduction <add>, %47, %cst_19 [1] : vector<16x16xf32> to vector<16xf32>
    %49 = vector.shape_cast %48 : vector<16xf32> to vector<16x1xf32>
    %cst_20 = arith.constant 6.250000e-02 : f32
    %50 = vector.broadcast %cst_20 : f32 to vector<16x1xf32>
    %51 = arith.mulf %49, %50 : vector<16x1xf32>
    %52 = arith.mulf %46, %46 : vector<16x1xf32>
    %53 = arith.subf %51, %52 : vector<16x1xf32>
    %cst_21 = arith.constant 0.000000e+00 : f32
    %54 = vector.broadcast %cst_21 : f32 to vector<16x1xf32>
    %55 = arith.maximumf %53, %54 : vector<16x1xf32>
    %56 = vector.broadcast %46 : vector<16x1xf32> to vector<16x16xf32>
    %57 = arith.subf %42, %56 : vector<16x16xf32>
    %cst_22 = arith.constant 9.99999974E-6 : f32
    %58 = vector.broadcast %cst_22 : f32 to vector<16x1xf32>
    %59 = arith.addf %55, %58 : vector<16x1xf32>
    %60 = math.rsqrt %59 : vector<16x1xf32>
    %61 = vector.broadcast %60 : vector<16x1xf32> to vector<16x16xf32>
    %62 = arith.mulf %57, %61 : vector<16x16xf32>
    %63 = tpu.iota {dimensions = array<i32: 0>} : vector<16x1xi32>
    %c16_i32_23 = arith.constant 16 : i32
    %64 = arith.addi %0, %c16_i32_23 : i32
    %65 = vector.broadcast %64 : i32 to vector<16x1xi32>
    %66 = arith.addi %65, %63 : vector<16x1xi32>
    %c40_i32_24 = arith.constant 40 : i32
    %67 = vector.broadcast %c40_i32_24 : i32 to vector<16x1xi32>
    %68 = arith.cmpi slt, %66, %67 : vector<16x1xi32>
    %69 = vector.shape_cast %68 : vector<16x1xi1> to vector<16x1xi1>
    %70 = vector.broadcast %69 : vector<16x1xi1> to vector<16x16xi1>
    %71 = vector.shape_cast %1 : vector<1x16xf32> to vector<1x16xf32>
    %72 = vector.broadcast %71 : vector<1x16xf32> to vector<16x16xf32>
    %73 = arith.select %70, %62, %72 : vector<16x16xi1>, vector<16x16xf32>
    %c32 = arith.constant 32 : index
    %c0_25 = arith.constant 0 : index
    %74 = vector.load %arg10[%c32, %c0_25] : memref<48x16xf32, #tpu.memory_space<vmem>>, vector<16x16xf32>
    tpu.vector_store %arg10[%c32, %c0_25], %73 {strides = array<i32>} : memref<48x16xf32, #tpu.memory_space<vmem>>, vector<16x16xf32>,
    %c0_26 = arith.constant 0 : index
    %c0_27 = arith.constant 0 : index
    %75 = vector.load %arg7[%c0_26, %c0_27] : memref<1x16xf32, #tpu.memory_space<vmem>>, vector<1x16xf32>
    %c13 = arith.constant 13 : index
    %c0_28 = arith.constant 0 : index
    %76 = vector.load %arg10[%c13, %c0_28] : memref<48x16xf32, #tpu.memory_space<vmem>>, vector<16x16xf32>
    %c0_29 = arith.constant 0 : index
    %c0_30 = arith.constant 0 : index
    %77 = vector.load %arg6[%c0_29, %c0_30] : memref<7x16xf32, #tpu.memory_space<vmem>>, vector<1x16xf32>
    %78 = vector.broadcast %77 : vector<1x16xf32> to vector<16x16xf32>
    %79 = arith.mulf %76, %78 : vector<16x16xf32>
    %80 = vector.broadcast %75 : vector<1x16xf32> to vector<16x16xf32>
    %81 = arith.addf %80, %79 : vector<16x16xf32>
    %c14 = arith.constant 14 : index
    %c0_31 = arith.constant 0 : index
    %82 = vector.load %arg10[%c14, %c0_31] : memref<48x16xf32, #tpu.memory_space<vmem>>, vector<16x16xf32>
    %c1 = arith.constant 1 : index
    %c0_32 = arith.constant 0 : index
    %83 = vector.load %arg6[%c1, %c0_32] : memref<7x16xf32, #tpu.memory_space<vmem>>, vector<1x16xf32>
    %84 = vector.broadcast %83 : vector<1x16xf32> to vector<16x16xf32>
    %85 = arith.mulf %82, %84 : vector<16x16xf32>
    %86 = arith.addf %81, %85 : vector<16x16xf32>
    %c15 = arith.constant 15 : index
    %c0_33 = arith.constant 0 : index
    %87 = vector.load %arg10[%c15, %c0_33] : memref<48x16xf32, #tpu.memory_space<vmem>>, vector<16x16xf32>
    %c2 = arith.constant 2 : index
    %c0_34 = arith.constant 0 : index
    %88 = vector.load %arg6[%c2, %c0_34] : memref<7x16xf32, #tpu.memory_space<vmem>>, vector<1x16xf32>
    %89 = vector.broadcast %88 : vector<1x16xf32> to vector<16x16xf32>
    %90 = arith.mulf %87, %89 : vector<16x16xf32>
    %91 = arith.addf %86, %90 : vector<16x16xf32>
    %c16_35 = arith.constant 16 : index
    %c0_36 = arith.constant 0 : index
    %92 = vector.load %arg10[%c16_35, %c0_36] : memref<48x16xf32, #tpu.memory_space<vmem>>, vector<16x16xf32>
    %c3 = arith.constant 3 : index
    %c0_37 = arith.constant 0 : index
    %93 = vector.load %arg6[%c3, %c0_37] : memref<7x16xf32, #tpu.memory_space<vmem>>, vector<1x16xf32>
    %94 = vector.broadcast %93 : vector<1x16xf32> to vector<16x16xf32>
    %95 = arith.mulf %92, %94 : vector<16x16xf32>
    %96 = arith.addf %91, %95 : vector<16x16xf32>
    %c17 = arith.constant 17 : index
    %c0_38 = arith.constant 0 : index
    %97 = vector.load %arg10[%c17, %c0_38] : memref<48x16xf32, #tpu.memory_space<vmem>>, vector<16x16xf32>
    %c4 = arith.constant 4 : index
    %c0_39 = arith.constant 0 : index
    %98 = vector.load %arg6[%c4, %c0_39] : memref<7x16xf32, #tpu.memory_space<vmem>>, vector<1x16xf32>
    %99 = vector.broadcast %98 : vector<1x16xf32> to vector<16x16xf32>
    %100 = arith.mulf %97, %99 : vector<16x16xf32>
    %101 = arith.addf %96, %100 : vector<16x16xf32>
    %c18 = arith.constant 18 : index
    %c0_40 = arith.constant 0 : index
    %102 = vector.load %arg10[%c18, %c0_40] : memref<48x16xf32, #tpu.memory_space<vmem>>, vector<16x16xf32>
    %c5 = arith.constant 5 : index
    %c0_41 = arith.constant 0 : index
    %103 = vector.load %arg6[%c5, %c0_41] : memref<7x16xf32, #tpu.memory_space<vmem>>, vector<1x16xf32>
    %104 = vector.broadcast %103 : vector<1x16xf32> to vector<16x16xf32>
    %105 = arith.mulf %102, %104 : vector<16x16xf32>
    %106 = arith.addf %101, %105 : vector<16x16xf32>
    %c19 = arith.constant 19 : index
    %c0_42 = arith.constant 0 : index
    %107 = vector.load %arg10[%c19, %c0_42] : memref<48x16xf32, #tpu.memory_space<vmem>>, vector<16x16xf32>
    %c6 = arith.constant 6 : index
    %c0_43 = arith.constant 0 : index
    %108 = vector.load %arg6[%c6, %c0_43] : memref<7x16xf32, #tpu.memory_space<vmem>>, vector<1x16xf32>
    %109 = vector.broadcast %108 : vector<1x16xf32> to vector<16x16xf32>
    %110 = arith.mulf %107, %109 : vector<16x16xf32>
    %111 = arith.addf %106, %110 : vector<16x16xf32>
    %c0_44 = arith.constant 0 : index
    %c0_45 = arith.constant 0 : index
    %c0_46 = arith.constant 0 : index
    %112 = vector.load %arg2[%c0_44, %c0_45, %c0_46] : memref<1x16x16xf32, #tpu.memory_space<vmem>>, vector<1x16x16xf32>
    %113 = vector.shape_cast %112 : vector<1x16x16xf32> to vector<16x16xf32>
    %114 = arith.mulf %113, %111 : vector<16x16xf32>
    %c0_47 = arith.constant 0 : index
    %c0_48 = arith.constant 0 : index
    %c0_49 = arith.constant 0 : index
    %115 = vector.load %arg9[%c0_47, %c0_48, %c0_49] : memref<1x16x16xf32, #tpu.memory_space<vmem>>, vector<1x16x16xf32>
    %116 = vector.shape_cast %115 : vector<1x16x16xf32> to vector<16x16xf32>
    %117 = vector.shape_cast %114 : vector<16x16xf32> to vector<1x16x16xf32>
    tpu.vector_store %arg9[%c0_47, %c0_48, %c0_49], %117 {strides = array<i32>} : memref<1x16x16xf32, #tpu.memory_space<vmem>>, vector<1x16x16xf32>,
    return
  }
  func.func @transform_0(%arg0: i32, %arg1: i32) -> (i32, i32, i32) {
    %c0_i32 = arith.constant 0 : i32
    %c0_i32_0 = arith.constant 0 : i32
    return %arg0, %arg1, %c0_i32 : i32, i32, i32
  }
  func.func @transform_1(%arg0: i32, %arg1: i32) -> (i32, i32, i32) {
    %c0_i32 = arith.constant 0 : i32
    %c0_i32_0 = arith.constant 0 : i32
    return %arg0, %arg1, %c0_i32 : i32, i32, i32
  }
  func.func @transform_2(%arg0: i32, %arg1: i32) -> (i32, i32, i32) {
    %c1_i32 = arith.constant 1 : i32
    %0 = arith.muli %arg1, %c1_i32 : i32
    %c1_i32_0 = arith.constant 1 : i32
    %1 = arith.subi %0, %c1_i32_0 : i32
    %c0_i32 = arith.constant 0 : i32
    %2 = arith.maxsi %1, %c0_i32 : i32
    %c0_i32_1 = arith.constant 0 : i32
    %c0_i32_2 = arith.constant 0 : i32
    return %arg0, %2, %c0_i32_1 : i32, i32, i32
  }
  func.func @transform_3(%arg0: i32, %arg1: i32) -> (i32, i32, i32) {
    %c1_i32 = arith.constant 1 : i32
    %0 = arith.addi %arg1, %c1_i32 : i32
    %c1_i32_0 = arith.constant 1 : i32
    %1 = arith.muli %0, %c1_i32_0 : i32
    %c2_i32 = arith.constant 2 : i32
    %2 = arith.minsi %1, %c2_i32 : i32
    %c0_i32 = arith.constant 0 : i32
    %c0_i32_1 = arith.constant 0 : i32
    return %arg0, %2, %c0_i32 : i32, i32, i32
  }
  func.func @transform_4(%arg0: i32, %arg1: i32) -> (i32, i32) {
    %c0_i32 = arith.constant 0 : i32
    %c0_i32_0 = arith.constant 0 : i32
    %c0_i32_1 = arith.constant 0 : i32
    return %c0_i32, %c0_i32_0 : i32, i32
  }
  func.func @transform_5(%arg0: i32, %arg1: i32) -> (i32, i32) {
    %c0_i32 = arith.constant 0 : i32
    %c0_i32_0 = arith.constant 0 : i32
    %c0_i32_1 = arith.constant 0 : i32
    return %c0_i32, %c0_i32_0 : i32, i32
  }
  func.func @transform_6(%arg0: i32, %arg1: i32) -> (i32, i32) {
    %c0_i32 = arith.constant 0 : i32
    %c0_i32_0 = arith.constant 0 : i32
    %c0_i32_1 = arith.constant 0 : i32
    return %c0_i32, %c0_i32_0 : i32, i32
  }
  func.func @transform_7(%arg0: i32, %arg1: i32) -> (i32, i32, i32) {
    %c0_i32 = arith.constant 0 : i32
    %c0_i32_0 = arith.constant 0 : i32
    return %arg0, %arg1, %c0_i32 : i32, i32, i32
  }
}

</mosaic_0001>

<bundles_post_ra>
// kernel: tpu_custom_call.1
= control target key start
LH: loop header
LB: loop body
LE: loop exit
PB: predicated region body
PF: predicated region fallthrough
CT: control target
= control target key end

     0   :  { %s1646_s0 = inlined_call_operand.vmem [shape: f32[2,40,16], index: 0, kind: input, shape index: {}]   ;;  %s1647_s1 = inlined_call_operand.vmem [shape: f32[2,40,16], index: 1, kind: input, shape index: {}]   ;;  %s1648_s2 = inlined_call_operand.vmem [shape: f32[2,40,16], index: 2, kind: input, shape index: {}]   ;;  %s1649_s3 = inlined_call_operand.vmem [shape: f32[2,40,16], index: 3, kind: input, shape index: {}]   ;;  %s1650_s4 = inlined_call_operand.vmem [shape: f32[7,16], index: 4, kind: input, shape index: {}]   ;;  %s1651_s5 = inlined_call_operand.vmem [shape: f32[1,16], index: 5, kind: input, shape index: {}]   ;;  %s1652_s6 = inlined_call_operand.vmem [shape: f32[1,16], index: 6, kind: input, shape index: {}]   ;;  %s1653_s7 = inlined_call_operand.vmem [shape: f32[2,40,16], index: 7, kind: output, shape index: {}]  }
   0x1   :  { %1657 = sst [smem:[#allocation7_spill]] %s1646_s0 }
   0x2   :  { %1658 = sst [smem:[#allocation8_spill]] %s1647_s1 }
   0x3   :  { %s1418_s24 = smov 0   ;;  %s1420_s25 = smov 0  }
   0x4   :  { %s1422_s26 = smov 0   ;;  %s1424_s27 = smov 0  }
   0x5   :  { %s1426_s28 = smov 0   ;;  %s1428_s29 = smov 0  }
   0x6   :  { %s1430_s30 = smov 0  }
   0x7 LB: > { %1659 = sst [smem:[#allocation4_spill]] %s1340_s29  ;;  %s26_s8 = sadd.s32 1, %s1336_s28  ;;  %s1344_s30 = sphi %s1430_s30, %s17_s30   ;;  %s1340_s29 = sphi %s1428_s29, %s1667_s29   ;;  %s1336_s28 = sphi %s1426_s28, %s1671_s28   ;;  %s1332_s27 = sphi %s1424_s27, %s1665_s27   ;;  %s1328_s26 = sphi %s1422_s26, %s1670_s26   ;;  %s1324_s25 = sphi %s1420_s25, %s1669_s25   ;;  %s1320_s24 = sphi %s1418_s24, %s1668_s24  }
   0x8   : > { %p27_p0 = scmp.ge.s32.totalorder %s26_s8, 3  ;;  %s29_s9 = sadd.s32 1, %s1340_s29 }
   0x9   : > { %s1076_s10 = sadd.s32 4294967295, %s1344_s30   ;;  %p235_p1 = scmp.ne.s32.totalorder %s1324_s25, %s1320_s24 }
   0xa   : > { %s1673_s8 = smov (%p27_p0, %s26_s8), 0  ;;  %s1675_s9 = smov (!%p27_p0, %s29_s9), %s1340_s29 }
   0xb   : > { %1660 = sst [smem:[#allocation5_spill]] %s1673_s8  ;;  %s221_s11 = ssub.s32 %s1336_s28, %s1673_s8 }
   0xc   : > { %p236_p2 = scmp.eq.s32.totalorder %s1076_s10, 5  ;;  %p31_p3 = scmp.ge.s32.totalorder %s1675_s9, 2 }
   0xd   : > { %p1082_p4 = scmp.ge.s32.totalorder %s1344_s30, 1  ;;  %p365_p6 = scmp.lt.s32.totalorder %s1344_s30, 7 }
   0xe   : > { %p1464_p5 = por %p236_p2, %p235_p1  ;;  %s1677_s9 = smov (%p31_p3, %s1675_s9), 0 }
   0xf   : > { %1662 = sst [smem:[#allocation6_spill]] %s1677_s9  ;;  %p366_p7 = pnand %p1082_p4, %p365_p6 }
  0x10   : > { %s220_s13 = ssub.s32 %s1340_s29, %s1677_s9  ;;  %s225_s15 = sadd.s32 1, %s1324_s25  ;;  %vm542_vm0 = vcmask (!%p366_p7), 130048   ;;  %v575_v20 = vlaneseq (!%p366_p7)  ;;  %v1526_v31 = vld [vmem:[%s1652_s6] ss:$0 sm:$0xff] (!%p366_p7) }
  0x11   : > { %s222_s14 = sor.u32 %s221_s11, %s220_s13  ;;  %369 = sbr.rel (%p366_p7) target bundleno = 616 (0x268), region = 48 }
  0x12   : > { %p223_p8 = scmp.eq.s32.totalorder %s222_s14, 0  ;;  %s1478_s17 = sshll.u32 (!%p366_p7), %s1328_s26, 1  ;;  %v1517_v24 = vshrl.u32 (!%p366_p7), %v575_v20, 7 }
  0x13   : > { %p454_p9 = scmp.lt.s32.totalorder (!%p366_p7), %s1332_s27, 1  ;;  %p456_p10 = scmp.lt.s32.totalorder (!%p366_p7), %s1478_s17, 4 }
  0x14   : > { %s1475_s16 = scalar_select %p223_p8, %s1324_s25, %s225_s15  }
  0x15   : > { %s1088_s18 = sadd.s32 (!%p366_p7), 4294967295, %s1328_s26  ;;  %s509_s22 = sadd.s32 (!%p366_p7), 1, %s1328_s26  ;;  %v577_v28 = vadd.s32 (!%p366_p7), 8, %v1517_v24 }
  0x16   : > { %p486_p11 = scmp.gt.s32.totalorder (!%p366_p7), %s1088_s18, 0  ;;  %p510_p12 = scmp.lt.s32.totalorder (!%p366_p7), %s509_s22, 2 }
  0x17   : > { %s1663_s1 = sld [smem:[#allocation8_spill]] (!%p366_p7)  ;;  %s1664_s0 = sld [smem:[#allocation7_spill]] (!%p366_p7) }
  0x18   : > { %s455_s19 = scalar_select %p454_p9, %s1332_s27, 1 }
  0x19   : > { %s457_s20 = scalar_select %p456_p10, %s1478_s17, 4 }
  0x1a   : > { %s1485_s21 = smul.u32 5, %s455_s19  ;;  %s1679_s18 = smov (!%p486_p11, %s1088_s18), 0 }
  0x1b   : > { %s1681_s22 = smov (!%p510_p12, %s509_s22), 2  ;;  %s1089_s19 = sshll.u32 %s1679_s18, 1 }
  0x1c   : > { %s459_s23 = sadd.s32 %s1485_s21, %s457_s20  ;;  %p495_p13 = scmp.lt.s32.totalorder %s1089_s19, 4 }
  0x1d   : > { %s1085_s10 = sshll.u32 %s459_s23, 3  ;;  %s1091_s20 = sshll.u32 %s1681_s22, 1 }
  0x1e   : > { %s479_s14 = scalar_lea.vmem %s1663_s1, %s1085_s10  ;;  %s1495_s8 = scalar_lea.vmem %s1664_s0, %s1085_s10 }
  0x1f   : > { %v540_v0 = vld [vmem:[%s479_s14] sm:$0xff]  ;;  %v541_v1 = vld [vmem:[%s479_s14 + $0x8] sm:$0xff]  ;;  %p519_p0 = scmp.lt.s32.totalorder %s1091_s20, 4  ;;  %s1683_s19 = smov (!%p495_p13, %s1089_s19), 4 }
  0x20   : > { %v543_v2 = vsel %vm542_vm0, %v540_v0, 0.0  ;;  %v551_v3 = vmul.f32 %v540_v0, %v540_v0  ;;  %v552_v4 = vmul.f32 %v541_v1, %v541_v1  ;;  %v546_v6 = vsel %vm542_vm0, %v541_v1, 0.0  ;;  %s498_s9 = sadd.s32 %s1485_s21, %s1683_s19  ;;  %s446_s1 = sand.u32 1, %s1320_s24  }
  0x21   : > { %544 = vadd.xlane.f32.xlu0 %v543_v2  ;;  %s1685_s20 = smov (!%p519_p0, %s1091_s20), 4  ;;  %s1090_s23 = sshll.u32 %s498_s9, 3 }
  0x22   : > { %v553_v5 = vsel %vm542_vm0, %v551_v3, 0.0  ;;  %v556_v7 = vsel %vm542_vm0, %v552_v4, 0.0  ;;  %s522_s10 = sadd.s32 %s1485_s21, %s1685_s20  ;;  %s1506_s22 = scalar_lea.vmem %s1648_s2, %s1090_s23 }
  0x23   : > { %554 = vadd.xlane.f32.xlu1 %v553_v5  ;;  %s1092_s13 = sshll.u32 %s522_s10, 3  ;;  %s1514_s29 = sshll.u32 %s446_s1, 4 }
  0x24   : > { %s1511_s0 = scalar_lea.vmem %s1649_s3, %s1092_s13  ;;  %s1093_s24 = sshll.u32 %s1328_s26, 4 }
  0x25   : > { %547 = vadd.xlane.f32.xlu0 %v546_v6  ;;  %v578_v26 = vstv %s1093_s24  ;;  %s1533_s19 = scalar_lea.vmem [#allocation3], %s1514_s29   ;;  %p1095_p1 = scmp.ne.s32.totalorder %s1328_s26, 0 }
  0x26   : > { %v579_v27 = vadd.s32 %v578_v26, %v1517_v24  ;;  %v580_v32 = vadd.s32 %v578_v26, %v577_v28  ;;  %602 = vst.msk [vmem:[#allocation2 + $0x8] sm:$0xff] (!%p1095_p1), %vm542_vm0, %v1526_v31 }
  0x27   : > { %557 = vadd.xlane.f32.xlu1 %v556_v7 }
  0x28   : > { %vm581_vm1 = vcmp.lt.s32.totalorder %v579_v27, 40  ;;  %vm582_vm2 = vcmp.lt.s32.totalorder %v580_v32, 40 }
  0xae   : > { %v545_v8 = vpop.xlane.xlu0 %544 }
  0xaf   : > { %v549_v9 = vmul.f32 0.0625, %v545_v8 }
  0xb0   : > { %v555_v10 = vpop.xlane.xlu1 %554 }
  0xb1   : > { %v561_v11 = vmul.f32 %v549_v9, %v549_v9  ;;  %v559_v12 = vmul.f32 0.0625, %v555_v10  ;;  %v567_v29 = vsub.f32 %v540_v0, %v549_v9 }
  0xb2   : > { %v548_v13 = vpop.xlane.xlu0 %547 }
  0xb3   : > { %v563_v14 = vsub.f32 %v559_v12, %v561_v11  ;;  %v550_v15 = vmul.f32 0.0625, %v548_v13 }
  0xb4   : > { %v558_v16 = vpop.xlane.xlu1 %557 }
  0xb5   : > { %v565_v17 = vmax.f32 %v563_v14, 0.0  ;;  %v562_v18 = vmul.f32 %v550_v15, %v550_v15  ;;  %v560_v19 = vmul.f32 0.0625, %v558_v16  ;;  %v568_v35 = vsub.f32 %v541_v1, %v550_v15 }
  0xb7   : > { %v569_v21 = vadd.f32 1e-05, %v565_v17  ;;  %v564_v22 = vsub.f32 %v560_v19, %v562_v18 }
  0xb9   : > { %1246 = vrsqrt.f32 %v569_v21  ;;  %v566_v23 = vmax.f32 %v564_v22, 0.0 }
  0xbb   : > { %v570_v25 = vadd.f32 1e-05, %v566_v23 }
  0xbd   : > { %1248 = vrsqrt.f32 %v570_v25 }
  0xc3   : > { %v1247_v30 = vpop.eup %1246 }
  0xc4   : > { %v573_v33 = vmul.f32 %v1247_v30, %v567_v29 }
  0xc5   : > { %600 = sbr.rel (%p1095_p1) target bundleno = 204 (0xcc), region = 52 }
  0xc6   : > { %v593_v34 = vsel %vm581_vm1, %v573_v33, %v1526_v31 }
  0xc7   : > { %v1249_v36 = vpop.eup %1248  ;;  %595 = vst.msk [vmem:[#allocation2 + $0x10] sm:$0xff] %vm542_vm0, %v593_v34 }
  0xc8   : > { %v574_v37 = vmul.f32 %v1249_v36, %v568_v35 }
  0xca   : > { %v594_v38 = vsel %vm582_vm2, %v574_v37, %v1526_v31 }
  0xcb   : > { %596 = vst.msk [vmem:[#allocation2 + $0x18] sm:$0xff] %vm542_vm0, %v594_v38 }
  0xcc PF: > { %p1096_p2 = scmp.le.s32.totalorder %s1328_s26, 0 }
  0xcd   : > { %v607_v39 = vld [vmem:[%s1506_s22] sm:$0xff] (!%p1096_p2)  ;;  %v608_v40 = vld [vmem:[%s1506_s22 + $0x8] sm:$0xff] (!%p1096_p2) }
  0xce   : > { %606 = sbr.rel (%p1096_p2) target bundleno = 377 (0x179), region = 56  ;;  %v609_v41 = vsel (!%p1096_p2), %vm542_vm0, %v607_v39, 0.0  ;;  %v617_v42 = vmul.f32 (!%p1096_p2), %v607_v39, %v607_v39  ;;  %v618_v43 = vmul.f32 (!%p1096_p2), %v608_v40, %v608_v40  ;;  %v612_v45 = vsel (!%p1096_p2), %vm542_vm0, %v608_v40, 0.0 }
  0xcf   : > { %610 = vadd.xlane.f32.xlu0 (!%p1096_p2), %v609_v41 }
  0xd0   : > { %v619_v44 = vsel (!%p1096_p2), %vm542_vm0, %v617_v42, 0.0  ;;  %v622_v46 = vsel (!%p1096_p2), %vm542_vm0, %v618_v43, 0.0 }
  0xd1   : > { %620 = vadd.xlane.f32.xlu1 (!%p1096_p2), %v619_v44 }
  0xd3   : > { %613 = vadd.xlane.f32.xlu0 (!%p1096_p2), %v612_v45 }
  0xd5   : > { %623 = vadd.xlane.f32.xlu1 %v622_v46 }
 0x15c   : > { %v611_v47 = vpop.xlane.xlu0 %610 }
 0x15d   : > { %v615_v48 = vmul.f32 0.0625, %v611_v47 }
 0x15e   : > { %v621_v49 = vpop.xlane.xlu1 %620 }
 0x15f   : > { %v627_v50 = vmul.f32 %v615_v48, %v615_v48  ;;  %v625_v51 = vmul.f32 0.0625, %v621_v49 }
 0x160   : > { %v614_v52 = vpop.xlane.xlu0 %613 }
 0x161   : > { %v629_v53 = vsub.f32 %v625_v51, %v627_v50  ;;  %v616_v54 = vmul.f32 0.0625, %v614_v52 }
 0x162   : > { %v624_v55 = vpop.xlane.xlu1 %623 }
 0x163   : > { %v631_v56 = vmax.f32 %v629_v53, 0.0  ;;  %v628_v57 = vmul.f32 %v616_v54, %v616_v54  ;;  %v626_v58 = vmul.f32 0.0625, %v624_v55  ;;  %v634_v0 = vsub.f32 %v608_v40, %v616_v54 }
 0x165   : > { %v635_v59 = vadd.f32 1e-05, %v631_v56  ;;  %v630_v60 = vsub.f32 %v626_v58, %v628_v57 }
 0x167   : > { %1250 = vrsqrt.f32 %v635_v59  ;;  %v632_v61 = vmax.f32 %v630_v60, 0.0 }
 0x169   : > { %v636_v62 = vadd.f32 1e-05, %v632_v61 }
 0x16b   : > { %1252 = vrsqrt.f32 %v636_v62 }
 0x171   : > { %v1251_v63 = vpop.eup %1250 }
 0x175   : > { %v1253_v1 = vpop.eup %1252 }
 0x176   : > { %v640_v2 = vmul.f32 %v1253_v1, %v634_v0 }
 0x178   : > { %642 = vst.msk [vmem:[#allocation2 + $0x8] sm:$0xff] %vm542_vm0, %v640_v2 }
 0x179 PF: > { %v644_v3 = vld [vmem:[%s1511_s0 + $0x8] sm:$0xff]  ;;  %v1548_v4 = vld [vmem:[%s1511_s0] sm:$0xff]  ;;  %v693_v12 = vld [vmem:[#allocation2 + $0x15] sm:$0xff]  ;;  %s677_s20 = sadd.s32 16, %s1093_s24  ;;  %s789_s26 = ssub.s32 (%p1464_p5), 5, %s1478_s17 }
 0x17a   : > { %v648_v5 = vsel %vm542_vm0, %v644_v3, 0.0  ;;  %v645_v6 = vsel %vm542_vm0, %v1548_v4, 0.0  ;;  %v654_v7 = vmul.f32 %v644_v3, %v644_v3  ;;  %v653_v8 = vmul.f32 %v1548_v4, %v1548_v4  ;;  %v1097_v13 = vld [vmem:[%s1650_s4] ss:$0 sm:$0xff]  ;;  %v710_v18 = vld [vmem:[#allocation2 + $0x16] sm:$0xff]  ;;  %s1125_s24 = smul.u32 (%p1464_p5), 5, %s1332_s27 }
 0x17b   : > { %649 = vadd.xlane.f32.xlu1 %v648_v5  ;;  %646 = vadd.xlane.f32.xlu0 %v645_v6  ;;  %v1098_v14 = vld [vmem:[%s1651_s5] ss:$0 sm:$0xff]  ;;  %v700_v16 = vmul.f32 %v1097_v13, %v693_v12  ;;  %v1099_v19 = vld [vmem:[%s1650_s4 + $0x1] ss:$0 sm:$0xff]  ;;  %v721_v21 = vld [vmem:[#allocation2 + $0x17] sm:$0xff]  ;;  %p790_p3 = scmp.lt.s32.totalorder (%p1464_p5), %s789_s26, 2 }
 0x17c   : > { %v658_v9 = vsel %vm542_vm0, %v654_v7, 0.0  ;;  %v655_v10 = vsel %vm542_vm0, %v653_v8, 0.0  ;;  %v717_v26 = vmul.f32 %v1099_v19, %v710_v18  ;;  %v1100_v27 = vld [vmem:[%s1650_s4 + $0x2] ss:$0 sm:$0xff]  ;;  %v731_v28 = vld [vmem:[#allocation2 + $0x10] sm:$0xff]  ;;  %v732_v29 = vld [vmem:[#allocation2 + $0x18] sm:$0xff]  ;;  %s795_s9 = sadd.s32 (%p1464_p5), %s1125_s24, %s1478_s17 }
 0x17d   : > { %v708_v23 = vadd.f32 %v1098_v14, %v700_v16  ;;  %v728_v32 = vmul.f32 %v1100_v27, %v721_v21  ;;  %v1101_v33 = vld [vmem:[%s1650_s4 + $0x3] ss:$0 sm:$0xff]  ;;  %v742_v34 = vld [vmem:[#allocation2 + $0x11] sm:$0xff]  ;;  %v1102_v35 = vld [vmem:[%s1650_s4 + $0x4] ss:$0 sm:$0xff]  ;;  %s1109_s23 = sshll.u32 (%p1464_p5), %s795_s9, 3 }
 0x17e   : > { %v738_v38 = vmul.f32 %v1101_v33, %v731_v28  ;;  %v739_v39 = vmul.f32 %v1101_v33, %v732_v29  ;;  %v753_v40 = vld [vmem:[#allocation2 + $0x12] sm:$0xff]  ;;  %v749_v43 = vmul.f32 %v1102_v35, %v742_v34  ;;  %v1103_v44 = vld [vmem:[%s1650_s4 + $0x5] ss:$0 sm:$0xff]  ;;  %v1104_v49 = vld [vmem:[%s1650_s4 + $0x6] ss:$0 sm:$0xff]  ;;  %s1604_s11 = scalar_lea.vmem (%p1464_p5), %s1653_s7, %s1109_s23  }
 0x17f   : > { %659 = vadd.xlane.f32.xlu1 %v658_v9  ;;  %656 = vadd.xlane.f32.xlu0 %v655_v10  ;;  %v692_v11 = vld [vmem:[#allocation2 + $0xd] sm:$0xff]  ;;  %v719_v37 = vadd.f32 %v717_v26, %v708_v23  ;;  %v760_v48 = vmul.f32 %v1103_v44, %v753_v40  ;;  %v775_v53 = vld [vmem:[%s1495_s8] sm:$0xff]  ;;  %v678_v9 = vstv %s677_s20 }
 0x180   : > { %v699_v15 = vmul.f32 %v1097_v13, %v692_v11  ;;  %v709_v17 = vld [vmem:[#allocation2 + $0xe] sm:$0xff]  ;;  %v679_v10 = vadd.s32 %v678_v9, %v1517_v24 }
 0x181   : > { %v720_v20 = vld [vmem:[#allocation2 + $0xf] sm:$0xff]  ;;  %v716_v25 = vmul.f32 %v1099_v19, %v709_v17  ;;  %v730_v42 = vadd.f32 %v728_v32, %v719_v37 }
 0x182   : > { %v707_v22 = vadd.f32 %v1098_v14, %v699_v15  ;;  %v727_v30 = vmul.f32 %v1100_v27, %v720_v20  ;;  %v764_v45 = vld [vmem:[#allocation2 + $0x13] sm:$0xff]  ;;  %vm681_vm3 = vcmp.lt.s32.totalorder %v679_v10, 40  ;;  %v776_v23 = vld [vmem:[%s1495_s8 + $0x8] sm:$0xff] }
 0x183   : > { %v741_v47 = vadd.f32 %v739_v39, %v730_v42  ;;  %v771_v51 = vmul.f32 %v1104_v49, %v764_v45 }
 0x184   : > { %v718_v36 = vadd.f32 %v716_v25, %v707_v22 }
 0x186   : > { %v729_v41 = vadd.f32 %v727_v30, %v718_v36 }
 0x188   : > { %v740_v46 = vadd.f32 %v738_v38, %v729_v41 }
 0x18a   : > { %v751_v50 = vadd.f32 %v749_v43, %v740_v46 }
 0x18c   : > { %v762_v52 = vadd.f32 %v760_v48, %v751_v50 }
 0x18e   : > { %v773_v54 = vadd.f32 %v771_v51, %v762_v52 }
 0x190   : > { %v777_v55 = vmul.f32 %v775_v53, %v773_v54 }
 0x192   : > { %779 = vst.msk [vmem:[%s1533_s19] sm:$0xff] %vm542_vm0, %v777_v55 }
 0x208   : > { %v650_v56 = vpop.xlane.xlu1 %649  ;;  %v647_v57 = vpop.xlane.xlu0 %646 }
 0x209   : > { %v652_v58 = vmul.f32 0.0625, %v650_v56  ;;  %v651_v59 = vmul.f32 0.0625, %v647_v57 }
 0x20b   : > { %v664_v60 = vmul.f32 %v652_v58, %v652_v58  ;;  %v663_v63 = vmul.f32 %v651_v59, %v651_v59  ;;  %v669_v12 = vsub.f32 %v1548_v4, %v651_v59 }
 0x20c   : > { %v660_v61 = vpop.xlane.xlu1 %659  ;;  %v657_v62 = vpop.xlane.xlu0 %656 }
 0x20d   : > { %v662_v0 = vmul.f32 0.0625, %v660_v61  ;;  %v661_v1 = vmul.f32 0.0625, %v657_v62 }
 0x20f   : > { %v666_v2 = vsub.f32 %v662_v0, %v664_v60  ;;  %v665_v3 = vsub.f32 %v661_v1, %v663_v63 }
 0x211   : > { %v668_v5 = vmax.f32 %v666_v2, 0.0  ;;  %v667_v6 = vmax.f32 %v665_v3, 0.0 }
 0x213   : > { %v672_v7 = vadd.f32 1e-05, %v668_v5  ;;  %v671_v8 = vadd.f32 1e-05, %v667_v6 }
 0x215   : > { %1254 = vrsqrt.f32 %v672_v7 }
 0x216   : > { %1256 = vrsqrt.f32 %v671_v8 }
 0x21f   : > { %v1255_v11 = vpop.eup %1254 }
 0x220   : > { %v1257_v13 = vpop.eup %1256 }
 0x221   : > { %v675_v14 = vmul.f32 %v1257_v13, %v669_v12 }
 0x223   : > { %v687_v15 = vsel %vm681_vm3, %v675_v14, %v1526_v31 }
 0x224   : > { %689 = vst.msk [vmem:[#allocation2 + $0x20] sm:$0xff] %vm542_vm0, %v687_v15 }
 0x22b   : > { %v743_v16 = vld [vmem:[#allocation2 + $0x19] sm:$0xff] }
 0x22c   : > { %v754_v17 = vld [vmem:[#allocation2 + $0x1a] sm:$0xff]  ;;  %v750_v18 = vmul.f32 %v1102_v35, %v743_v16 }
 0x22d   : > { %v765_v19 = vld [vmem:[#allocation2 + $0x1b] sm:$0xff]  ;;  %v761_v21 = vmul.f32 %v1103_v44, %v754_v17 }
 0x22e   : > { %v752_v20 = vadd.f32 %v750_v18, %v741_v47  ;;  %v772_v24 = vmul.f32 %v1104_v49, %v765_v19 }
 0x230   : > { %v763_v22 = vadd.f32 %v761_v21, %v752_v20  ;;  %787 = sbr.rel (!%p1464_p5) target bundleno = 616 (0x268), region = 60 }
 0x232   : > { %v774_v25 = vadd.f32 %v772_v24, %v763_v22 }
 0x234   : > { %v778_v26 = vmul.f32 %v776_v23, %v774_v25 }
 0x236   : > { %780 = vst.msk [vmem:[%s1533_s19 + $0x8] sm:$0xff] %vm542_vm0, %v778_v26 }
 0x237   : > { %s1687_s26 = smov (!%p790_p3, %s789_s26), 2 }
 0x238   : > { %s1107_s10 = sshll.u32 %s1687_s26, 7 }
 0x239   : > { %p1110_p4 = scmp.eq.s32.totalorder %s1107_s10, 0 }
 0x23a   : > { %s1607_s12 = sshrl.u32 (!%p1110_p4), %s1687_s26, 1 }
 0x23b   : > { %800 = sbr.rel (%p1110_p4) target bundleno = 616 (0x268), region = 64  ;;  %p1111_p5 = scmp.le.s32.totalorder (!%p1110_p4), %s1607_s12, 0 }
 0x242   : > { %1003 = sbr.rel (%p1111_p5) target bundleno = 595 (0x253), region = 149  ;;  %s1346_s27 = smov (!%p1111_p5), %s1604_s11  }
 0x243   : > { %s1350_s17 = smov (!%p1111_p5), %s1533_s19   ;;  %s1354_s22 = smov (!%p1111_p5), 0  }
 0x244   : > { %s1358_s13 = smov (!%p1111_p5), 0  }
 0x249 LB: >> { %v864_v31 = vld [vmem:[%s1352_s17] sm:$0xff]  ;;  %v866_v4 = vld [vmem:[%s1352_s17 + $0x8] sm:$0xff]  ;;  %s868_s14 = sadd.s32 1, %s1356_s22  ;;  %s858_s13 = sadd.s32 1, %s1360_s13   ;;  %s1360_s13 = sphi %s1358_s13, %s858_s13   ;;  %s1356_s22 = sphi %s1354_s22, %s1355_s22   ;;  %s1352_s17 = sphi %s1350_s17, %s873_s17   ;;  %s1348_s27 = sphi %s1346_s27, %s874_s27  }
 0x24a   : >> { %865 = vst [vmem:[%s1348_s27] sm:$0xff] %v864_v31  ;;  %867 = vst [vmem:[%s1348_s27 + $0x8] sm:$0xff] %v866_v4  ;;  %p869_p6 = scmp.ge.s32.totalorder %s868_s14, %s1607_s12  ;;  %p857_p7 = scmp.ge.s32.totalorder %s858_s13, %s1607_s12 }
 0x24c   : >> { %s1689_s14 = smov (%p869_p6, %s868_s14), 0  ;;  %860 = sbr.rel (!%p857_p7) target bundleno = 585 (0x249), region = 155 }
 0x24d   : >> { %s1112_s15 = sshll.u32 %s1689_s14, 4  ;;  %s1355_s22 = smov %s1689_s14  }
 0x24e   : >> { %s873_s17 = scalar_lea.vmem %s1533_s19, %s1112_s15 [#allocation3]   ;;  %s874_s27 = scalar_lea.vmem %s1604_s11, %s1112_s15  }
 0x253 PF: > { %s1617_s1 = sand.u32 1, %s1687_s26   ;;  %s1122_s21 = sshll.u32 %s1607_s12, 4 }
 0x254   : > { %s879_s0 = scalar_lea.vmem %s1533_s19, %s1122_s21 [#allocation3]   ;;  %s881_s29 = scalar_lea.vmem %s1604_s11, %s1122_s21  }
 0x255   : > { %p1117_p8 = scmp.le.s32.totalorder %s1617_s1, 0 }
 0x256   : > { %s1362_s20 = smov (!%p1117_p8), %s881_s29   ;;  %s1366_s24 = smov (!%p1117_p8), %s879_s0  }
 0x257   : > { %1017 = sbr.rel (%p1117_p8) target bundleno = 616 (0x268), region = 160  ;;  %s1370_s9 = smov (!%p1117_p8), 0  }
 0x258   : > { %s1374_s23 = smov (!%p1117_p8), 0  }
 0x25e LB: >> { %v891_v27 = vld [vmem:[%s1368_s24] sm:$0xff]  ;;  %s893_s26 = sadd.s32 1, %s1372_s9  ;;  %s885_s23 = sadd.s32 1, %s1376_s23   ;;  %s1376_s23 = sphi %s1374_s23, %s885_s23   ;;  %s1372_s9 = sphi %s1370_s9, %s1371_s9   ;;  %s1368_s24 = sphi %s1366_s24, %s898_s24   ;;  %s1364_s20 = sphi %s1362_s20, %s899_s20  }
 0x25f   : >> { %892 = vst [vmem:[%s1364_s20] sm:$0xff] %v891_v27  ;;  %p894_p9 = scmp.ge.s32.totalorder %s893_s26, %s1617_s1  ;;  %p884_p10 = scmp.ge.s32.totalorder %s885_s23, %s1617_s1 }
 0x261   : >> { %s1691_s26 = smov (%p894_p9, %s893_s26), 0  ;;  %887 = sbr.rel (!%p884_p10) target bundleno = 606 (0x25e), region = 166 }
 0x262   : >> { %s1118_s19 = sshll.u32 %s1691_s26, 3  ;;  %s1371_s9 = smov %s1691_s26  }
 0x263   : >> { %s898_s24 = scalar_lea.vmem %s879_s0, %s1118_s19 [#allocation3]   ;;  %s899_s20 = scalar_lea.vmem %s881_s29, %s1118_s19  }
 0x268 PF: > { %s17_s30 = sadd.s32 1, %s1344_s30   ;;  %s1665_s27 = sld [smem:[#allocation4_spill]] }
 0x269   : > { %p14_p11 = scmp.ge.s32.totalorder %s17_s30, 8   ;;  %s1666_s10 = sld [smem:[#allocation5_spill]] }
 0x26a   : > { %s1667_s29 = sld [smem:[#allocation6_spill]]  ;;  %s1668_s24 = smov %s1324_s25 }
 0x26b   : > { %s1669_s25 = smov %s1475_s16  ;;  %s1670_s26 = smov %s1336_s28 }
 0x26c   :  { %16 = sbr.rel (!%p14_p11) target bundleno = 7 (0x7), region = 177 }
 0x26f   : > { %s1671_s28 = smov %s1666_s10 }

</bundles_post_ra>
